<compile_context>
chip_gen: v7x
topology: tpu7x:2x2x1
jax: 0.10.0
libtpu: 0.0.40
codegen_flags: <defaults>
</compile_context>

<pallas_src>
import jax
import jax.numpy as jnp
from jax.experimental import pallas as pl
from jax.experimental.pallas import tpu as pltpu


def _round_up(n, m):
    return ((n + m - 1) // m) * m


def dnn_kernel(x_ref, w1_ref, b1_ref, w2_ref, b2_ref, w3t_ref, b3_ref, o_ref):
    # x arrives in its native f32; cast to bf16 on the VPU (plenty of slack)
    # right before the MXU, so HBM only ever sees 4B/elem of x, once.
    x = x_ref[...].astype(jnp.bfloat16)                                   # (TB, D)
    h1 = jnp.dot(x, w1_ref[...], preferred_element_type=jnp.float32)      # (TB, 64)
    h1 = jnp.maximum(h1 + b1_ref[...], 0.0)                               # relu(fc1)
    h2 = jnp.dot(h1.astype(jnp.bfloat16), w2_ref[...],
                 preferred_element_type=jnp.float32)                      # (TB, 32)
    h2 = jnp.maximum(h2 + b2_ref[...], 0.0)                               # relu(fc2)
    # fc3 has N=1: a (TB,32)x(32,1) matmul would use 1 MXU lane, so do it on the
    # VPU/XLU (slots with slack) as multiply + row-reduce in f32.
    h3 = jnp.sum(h2 * w3t_ref[...], axis=-1, keepdims=True)               # (TB, 1)
    o_ref[...] = (h3 + b3_ref[...]).astype(o_ref.dtype)


def model_dnn_forward(x, params):
    """x: (B, ...) -> flattened to (B, D) like torch .view(B, -1). Returns (B, 1) f32."""
    B = x.shape[0]
    x2d = x.reshape(B, -1)            # metadata-only reshape, no HBM copy
    D = x2d.shape[1]
    w1, b1, w2, b2, w3, b3 = params

    # Weights are tiny and VMEM-resident; keep them bf16 for the MXU.
    w1_bf = w1.astype(jnp.bfloat16)
    w2_bf = w2.astype(jnp.bfloat16)
    w3t = w3.reshape(1, -1).astype(jnp.float32)          # (1, 32) row for the VPU reduce

    # --- Tile sizing ---------------------------------------------------------
    # ~16 MiB budget for the double-buffered f32 x tile: safe on every
    # generation (v5e 16 MiB scoped default w/ explicit limit, v6e/v7x 32 MiB
    # defaults, v7x 64 MiB physical) and large enough (>=4 MiB DMA blocks for
    # small D) to sit at the HBM roofline.
    X_BUF_BUDGET = 16 << 20
    tb = X_BUF_BUDGET // (2 * D * 4)
    tb = max(8, min(4096, (tb // 8) * 8))                # sublane multiple, sane cap
    tb = min(tb, _round_up(B, 8))                        # never bigger than the batch
    nb = pl.cdiv(B, tb)
    if nb == 1 and B > 8:
        # v7x has 2 TensorCores; with a single grid step one core would idle.
        tb = _round_up(pl.cdiv(B, 2), 8)
        nb = pl.cdiv(B, tb)
    elif nb > 2 and nb % 2 == 1:
        # Nudge toward an even tile count for 2-TC load balance (best effort).
        cand = _round_up(pl.cdiv(B, nb + 1), 8)
        if cand >= 8:
            tb = cand
            nb = pl.cdiv(B, tb)

    # --- VMEM limit / cost hint ----------------------------------------------
    w_bytes = (D * 64 + 64 * 32) * 2 + (64 + 32 + 32 + 1) * 4   # single-buffered weights/biases
    vmem_needed = 2 * tb * D * 4 + w_bytes + 2 * tb * 4 + (4 << 20)   # x dbuf + weights + out + headroom
    vmem_limit = int(min(max(vmem_needed, 16 << 20), 40 << 20))

    flops = 2 * B * (D * 64 + 64 * 32 + 32)
    bytes_accessed = B * D * 4 + B * 4 + w_bytes          # f32 x in, f32 out, resident weights

    resident = dict(pipeline_mode=pl.Buffered(1))         # constant-index operands: 1 buffer

    out = pl.pallas_call(
        dnn_kernel,
        out_shape=jax.ShapeDtypeStruct((B, 1), jnp.float32),
        grid_spec=pltpu.PrefetchScalarGridSpec(
            num_scalar_prefetch=0,
            grid=(nb,),
            in_specs=[
                pl.BlockSpec((tb, D), lambda i: (i, 0)),               # x: streamed f32 per tile
                pl.BlockSpec(w1_bf.shape, lambda i: (0, 0), **resident),   # weights/biases:
                pl.BlockSpec(b1.shape, lambda i: (0, 0), **resident),      #   constant index_map,
                pl.BlockSpec(w2_bf.shape, lambda i: (0, 0), **resident),   #   DMA'd once,
                pl.BlockSpec(b2.shape, lambda i: (0, 0), **resident),      #   single VMEM buffer
                pl.BlockSpec(w3t.shape, lambda i: (0, 0), **resident),
                pl.BlockSpec(b3.shape, lambda i: (0, 0), **resident),
            ],
            out_specs=pl.BlockSpec((tb, 1), lambda i: (i, 0)),
        ),
        compiler_params=pltpu.CompilerParams(
            dimension_semantics=("parallel",),                          # megacore on v7x
            vmem_limit_bytes=vmem_limit),
        cost_estimate=pl.CostEstimate(
            flops=flops, transcendentals=0, bytes_accessed=bytes_accessed),
    )(x2d, w1_bf, b1, w2_bf, b2, w3t, b3)

    return out


def init_params(key, input_size):
    """nn.Linear-style init; weights stored (in, out) so the kernel computes x @ W + b."""
    ks = jax.random.split(key, 6)

    def lin(kw, kb, fan_in, fan_out):
        bound = 1.0 / jnp.sqrt(jnp.float32(fan_in))
        w = jax.random.uniform(kw, (fan_in, fan_out), jnp.float32, -bound, bound)
        b = jax.random.uniform(kb, (1, fan_out), jnp.float32, -bound, bound)
        return w, b

    w1, b1 = lin(ks[0], ks[1], input_size, 64)
    w2, b2 = lin(ks[2], ks[3], 64, 32)
    w3, b3 = lin(ks[4], ks[5], 32, 1)
    return (w1, b1, w2, b2, w3, b3)


if __name__ == "__main__":
    key = jax.random.PRNGKey(0)
    k_x, k_p = jax.random.split(key)

    # Small NCHW input; forward flattens it: input_size = 4*16*16 = 1024.
    B, C, H, W = 2, 4, 16, 16
    x = jax.random.normal(k_x, (B, C, H, W), jnp.float32)
    params = init_params(k_p, C * H * W)

    out = model_dnn_forward(x, params)
    out = jax.block_until_ready(out)

    # Pure-JAX reference with the same bf16-matmul / f32-accumulate treatment
    # as the kernel (documents the intentional numerics deviation from pure f32).
    w1, b1, w2, b2, w3, b3 = params
    xf = x.reshape(B, -1).astype(jnp.bfloat16)
    h1 = jnp.maximum(jnp.dot(xf, w1.astype(jnp.bfloat16),
                             preferred_element_type=jnp.float32) + b1, 0.0)
    h2 = jnp.maximum(jnp.dot(h1.astype(jnp.bfloat16), w2.astype(jnp.bfloat16),
                             preferred_element_type=jnp.float32) + b2, 0.0)
    ref = jnp.sum(h2 * w3.reshape(1, -1), axis=-1, keepdims=True) + b3

    assert out.shape == (B, 1)
    assert jnp.allclose(out, ref, atol=1e-3, rtol=1e-3), (out, ref)

    print("KERNEL_OK")
</pallas_src>

<mosaic_0001>
module attributes {stable_mosaic.version = 11 : i64} {
  func.func @dnn_kernel(%arg0: i32, %arg1: memref<8x1024xf32, #tpu.memory_space<vmem>>, %arg2: memref<1024x64xbf16, #tpu.memory_space<vmem>>, %arg3: memref<1x64xf32, #tpu.memory_space<vmem>>, %arg4: memref<64x32xbf16, #tpu.memory_space<vmem>>, %arg5: memref<1x32xf32, #tpu.memory_space<vmem>>, %arg6: memref<1x32xf32, #tpu.memory_space<vmem>>, %arg7: memref<1x1xf32, #tpu.memory_space<vmem>>, %arg8: memref<8x1xf32, #tpu.memory_space<vmem>>) attributes {dimension_semantics = [#tpu.dimension_semantics<parallel>], iteration_bounds = array<i64: 1>, scalar_prefetch = 0 : i64, scratch_operands = 0 : i64, tpu.core_type = #tpu.core_type<tc>, window_params = [{transform_indices = @transform_0, window_bounds = array<i64: 8, 1024>}, {pipeline_mode = #tpu.pipeline_mode<synchronous>, transform_indices = @transform_1, window_bounds = array<i64: 1024, 64>}, {pipeline_mode = #tpu.pipeline_mode<synchronous>, transform_indices = @transform_2, window_bounds = array<i64: 1, 64>}, {pipeline_mode = #tpu.pipeline_mode<synchronous>, transform_indices = @transform_3, window_bounds = array<i64: 64, 32>}, {pipeline_mode = #tpu.pipeline_mode<synchronous>, transform_indices = @transform_4, window_bounds = array<i64: 1, 32>}, {pipeline_mode = #tpu.pipeline_mode<synchronous>, transform_indices = @transform_5, window_bounds = array<i64: 1, 32>}, {pipeline_mode = #tpu.pipeline_mode<synchronous>, transform_indices = @transform_6, window_bounds = array<i64: 1, 1>}, {transform_indices = @transform_7, window_bounds = array<i64: 8, 1>}]} {
    %c0 = arith.constant 0 : index
    %c0_0 = arith.constant 0 : index
    %0 = vector.load %arg1[%c0, %c0_0] : memref<8x1024xf32, #tpu.memory_space<vmem>>, vector<8x1024xf32>
    %1 = arith.truncf %0 : vector<8x1024xf32> to vector<8x1024xbf16>
    %c0_1 = arith.constant 0 : index
    %c0_2 = arith.constant 0 : index
    %2 = vector.load %arg2[%c0_1, %c0_2] : memref<1024x64xbf16, #tpu.memory_space<vmem>>, vector<1024x64xbf16>
    %cst = arith.constant dense<0.000000e+00> : vector<8x64xf32>
    %3 = tpu.matmul %1, %2, %cst {dimension_numbers = #tpu.dot_dimension_numbers<[1], [0], [0], [1], [0, 0, 1, 1], [], []>} : vector<8x1024xbf16>, vector<1024x64xbf16>, vector<8x64xf32> -> vector<8x64xf32>
    %c0_3 = arith.constant 0 : index
    %c0_4 = arith.constant 0 : index
    %4 = vector.load %arg3[%c0_3, %c0_4] : memref<1x64xf32, #tpu.memory_space<vmem>>, vector<1x64xf32>
    %5 = vector.broadcast %4 : vector<1x64xf32> to vector<8x64xf32>
    %6 = arith.addf %3, %5 : vector<8x64xf32>
    %cst_5 = arith.constant 0.000000e+00 : f32
    %7 = vector.broadcast %cst_5 : f32 to vector<8x64xf32>
    %8 = arith.maximumf %6, %7 : vector<8x64xf32>
    %9 = arith.truncf %8 : vector<8x64xf32> to vector<8x64xbf16>
    %c0_6 = arith.constant 0 : index
    %c0_7 = arith.constant 0 : index
    %10 = vector.load %arg4[%c0_6, %c0_7] : memref<64x32xbf16, #tpu.memory_space<vmem>>, vector<64x32xbf16>
    %cst_8 = arith.constant dense<0.000000e+00> : vector<8x32xf32>
    %11 = tpu.matmul %9, %10, %cst_8 {dimension_numbers = #tpu.dot_dimension_numbers<[1], [0], [0], [1], [0, 0, 1, 1], [], []>} : vector<8x64xbf16>, vector<64x32xbf16>, vector<8x32xf32> -> vector<8x32xf32>
    %c0_9 = arith.constant 0 : index
    %c0_10 = arith.constant 0 : index
    %12 = vector.load %arg5[%c0_9, %c0_10] : memref<1x32xf32, #tpu.memory_space<vmem>>, vector<1x32xf32>
    %13 = vector.broadcast %12 : vector<1x32xf32> to vector<8x32xf32>
    %14 = arith.addf %11, %13 : vector<8x32xf32>
    %cst_11 = arith.constant 0.000000e+00 : f32
    %15 = vector.broadcast %cst_11 : f32 to vector<8x32xf32>
    %16 = arith.maximumf %14, %15 : vector<8x32xf32>
    %c0_12 = arith.constant 0 : index
    %c0_13 = arith.constant 0 : index
    %17 = vector.load %arg6[%c0_12, %c0_13] : memref<1x32xf32, #tpu.memory_space<vmem>>, vector<1x32xf32>
    %18 = vector.broadcast %17 : vector<1x32xf32> to vector<8x32xf32>
    %19 = arith.mulf %16, %18 : vector<8x32xf32>
    %cst_14 = arith.constant dense<0.000000e+00> : vector<8xf32>
    %20 = vector.multi_reduction <add>, %19, %cst_14 [1] : vector<8x32xf32> to vector<8xf32>
    %21 = vector.shape_cast %20 : vector<8xf32> to vector<8x1xf32>
    %c0_15 = arith.constant 0 : index
    %c0_16 = arith.constant 0 : index
    %22 = vector.load %arg7[%c0_15, %c0_16] : memref<1x1xf32, #tpu.memory_space<vmem>>, vector<1x1xf32>
    %23 = vector.broadcast %22 : vector<1x1xf32> to vector<8x1xf32>
    %24 = arith.addf %21, %23 : vector<8x1xf32>
    %c0_17 = arith.constant 0 : index
    %c0_18 = arith.constant 0 : index
    %25 = vector.load %arg8[%c0_17, %c0_18] : memref<8x1xf32, #tpu.memory_space<vmem>>, vector<8x1xf32>
    tpu.vector_store %arg8[%c0_17, %c0_18], %24 {strides = array<i32>} : memref<8x1xf32, #tpu.memory_space<vmem>>, vector<8x1xf32>,
    return
  }
  func.func @transform_0(%arg0: i32) -> (i32, i32) {
    %c0_i32 = arith.constant 0 : i32
    %c0_i32_0 = arith.constant 0 : i32
    return %arg0, %c0_i32 : i32, i32
  }
  func.func @transform_1(%arg0: i32) -> (i32, i32) {
    %c0_i32 = arith.constant 0 : i32
    %c0_i32_0 = arith.constant 0 : i32
    %c0_i32_1 = arith.constant 0 : i32
    return %c0_i32, %c0_i32_0 : i32, i32
  }
  func.func @transform_2(%arg0: i32) -> (i32, i32) {
    %c0_i32 = arith.constant 0 : i32
    %c0_i32_0 = arith.constant 0 : i32
    %c0_i32_1 = arith.constant 0 : i32
    return %c0_i32, %c0_i32_0 : i32, i32
  }
  func.func @transform_3(%arg0: i32) -> (i32, i32) {
    %c0_i32 = arith.constant 0 : i32
    %c0_i32_0 = arith.constant 0 : i32
    %c0_i32_1 = arith.constant 0 : i32
    return %c0_i32, %c0_i32_0 : i32, i32
  }
  func.func @transform_4(%arg0: i32) -> (i32, i32) {
    %c0_i32 = arith.constant 0 : i32
    %c0_i32_0 = arith.constant 0 : i32
    %c0_i32_1 = arith.constant 0 : i32
    return %c0_i32, %c0_i32_0 : i32, i32
  }
  func.func @transform_5(%arg0: i32) -> (i32, i32) {
    %c0_i32 = arith.constant 0 : i32
    %c0_i32_0 = arith.constant 0 : i32
    %c0_i32_1 = arith.constant 0 : i32
    return %c0_i32, %c0_i32_0 : i32, i32
  }
  func.func @transform_6(%arg0: i32) -> (i32, i32) {
    %c0_i32 = arith.constant 0 : i32
    %c0_i32_0 = arith.constant 0 : i32
    %c0_i32_1 = arith.constant 0 : i32
    return %c0_i32, %c0_i32_0 : i32, i32
  }
  func.func @transform_7(%arg0: i32) -> (i32, i32) {
    %c0_i32 = arith.constant 0 : i32
    %c0_i32_0 = arith.constant 0 : i32
    return %arg0, %c0_i32 : i32, i32
  }
}

</mosaic_0001>

<bundles_post_ra>
// kernel: tpu_custom_call.1
= control target key start
LH: loop header
LB: loop body
LE: loop exit
PB: predicated region body
PF: predicated region fallthrough
CT: control target
= control target key end

     0   :  { %s1516_s0 = inlined_call_operand.vmem [shape: f32[2,1024], index: 0, kind: input, shape index: {}]   ;;  %s1517_s1 = inlined_call_operand.vmem [shape: bf16[1024,64], index: 1, kind: input, shape index: {}]   ;;  %s1518_s2 = inlined_call_operand.vmem [shape: f32[1,64], index: 2, kind: input, shape index: {}]   ;;  %s1519_s3 = inlined_call_operand.vmem [shape: bf16[64,32], index: 3, kind: input, shape index: {}]   ;;  %s1520_s4 = inlined_call_operand.vmem [shape: f32[1,32], index: 4, kind: input, shape index: {}]   ;;  %s1521_s5 = inlined_call_operand.vmem [shape: f32[1,32], index: 5, kind: input, shape index: {}]   ;;  %s1522_s6 = inlined_call_operand.<no memory space> [shape: f32[1,1], index: 6, kind: input, shape index: {}]   ;;  %s1523_s7 = inlined_call_operand.vmem [shape: f32[2,1], index: 7, kind: output, shape index: {}]  }
   0x1   :  { %v12_v0 = vstv %s1522_s6 }
   0x2   :  { %13 = vst [vmem:[#allocation2] sm:$0x1] %v12_v0 }
   0x3   :  { %v1140_v1 = vld [vmem:[%s1517_s1 + $0x40] sm:$0xff]   ;;  %v1144_v5 = vld [vmem:[%s1517_s1 + $0x48] sm:$0xff]   ;;  %v1148_v9 = vld [vmem:[%s1517_s1 + $0x50] sm:$0xff]   ;;  %v52_v31 = vlaneseq  ;;  %v1220_v36 = vmov 1983009808   ;;  %vm1222_vm0 = vmmov 0  }
   0x4   :  { %v1141_v2 = vld [vmem:[%s1517_s1 + $0xc0] sm:$0xff]   ;;  %1032 = vmatprep.subr.bf16.mxu0 %v1140_v1  ;;  %v1145_v6 = vld [vmem:[%s1517_s1 + $0xc8] sm:$0xff]   ;;  %v1149_v10 = vld [vmem:[%s1517_s1 + $0xd0] sm:$0xff]   ;;  %v50_v37 = vunpack.c.l.s4 %v1220_v36  ;;  %vm853_vm1 = vcmask 523264   ;;  %vm906_vm2 = vcmask 261120   ;;  %vm918_vm3 = vcmask 7168  }
   0x5   :  { %v1142_v3 = vld [vmem:[%s1517_s1] sm:$0xff]   ;;  %1054 = vmatprep.subr.bf16.mxu1 %v1141_v2  ;;  %v1146_v7 = vld [vmem:[%s1517_s1 + $0x8] sm:$0xff]   ;;  %v1150_v11 = vld [vmem:[%s1517_s1 + $0x10] sm:$0xff]   ;;  %v53_v38 = vshrl.u32 %v52_v31, 7 }
   0x6   :  { %v1143_v4 = vld [vmem:[%s1517_s1 + $0x80] sm:$0xff]   ;;  %1033 = vmatpush3.bf16.msra.mxu0 %v1142_v3  ;;  %v1147_v8 = vld [vmem:[%s1517_s1 + $0x88] sm:$0xff]   ;;  %v1151_v12 = vld [vmem:[%s1517_s1 + $0x90] sm:$0xff]   ;;  %v51_v41 = vunpack.c.0.s8 %v50_v37 }
   0x7   :  { %1055 = vmatpush3.bf16.msra.mxu1 %v1143_v4  ;;  %1034 = vmatprep.subr.bf16.mxu0 %v1144_v5  ;;  %v1152_v13 = vld [vmem:[%s1517_s1 + $0x58] sm:$0xff]   ;;  %v1156_v17 = vld [vmem:[%s1517_s1 + $0x60] sm:$0xff]   ;;  %v1160_v21 = vld [vmem:[%s1517_s1 + $0x68] sm:$0xff]  }
   0x8   :  { %1056 = vmatprep.subr.bf16.mxu1 %v1145_v6  ;;  %v1153_v14 = vld [vmem:[%s1517_s1 + $0xd8] sm:$0xff]   ;;  %v1157_v18 = vld [vmem:[%s1517_s1 + $0xe0] sm:$0xff]   ;;  %v1161_v22 = vld [vmem:[%s1517_s1 + $0xe8] sm:$0xff]   ;;  %v1380_v44 = vsub.s32 %v51_v41, %v53_v38 }
   0x9   :  { %v1154_v15 = vld [vmem:[%s1517_s1 + $0x18] sm:$0xff]   ;;  %v1158_v19 = vld [vmem:[%s1517_s1 + $0x20] sm:$0xff]   ;;  %v1162_v23 = vld [vmem:[%s1517_s1 + $0x28] sm:$0xff]  }
   0xa   :  { %1035 = vmatpush3.bf16.msra.mxu0 %v1146_v7  ;;  %v1155_v16 = vld [vmem:[%s1517_s1 + $0x98] sm:$0xff]   ;;  %v1159_v20 = vld [vmem:[%s1517_s1 + $0xa0] sm:$0xff]   ;;  %v1163_v24 = vld [vmem:[%s1517_s1 + $0xa8] sm:$0xff]  }
   0xb   :  { %1057 = vmatpush3.bf16.msra.mxu1 %v1147_v8  ;;  %1036 = vmatprep.subr.bf16.mxu0 %v1148_v9  ;;  %v1164_v25 = vld [vmem:[%s1517_s1 + $0x70] sm:$0xff]   ;;  %v1168_v29 = vld [vmem:[%s1517_s1 + $0x78] sm:$0xff]   ;;  %v1178_v42 = vld [vmem:[%s1517_s1 + $0x140] sm:$0xff]  }
   0xc   :  { %1058 = vmatprep.subr.bf16.mxu1 %v1149_v10  ;;  %v1165_v26 = vld [vmem:[%s1517_s1 + $0xf0] sm:$0xff]   ;;  %v1169_v30 = vld [vmem:[%s1517_s1 + $0xf8] sm:$0xff]   ;;  %v1179_v43 = vld [vmem:[%s1517_s1 + $0x1c0] sm:$0xff]  }
   0xd   :  { %v1166_v27 = vld [vmem:[%s1517_s1 + $0x30] sm:$0xff]   ;;  %v1170_v32 = vld [vmem:[%s1517_s1 + $0x38] sm:$0xff]   ;;  %v1180_v53 = vld [vmem:[%s1517_s1 + $0x100] sm:$0xff]  }
   0xe   :  { %1037 = vmatpush3.bf16.msra.mxu0 %v1150_v11  ;;  %v1167_v28 = vld [vmem:[%s1517_s1 + $0xb0] sm:$0xff]   ;;  %v1171_v33 = vld [vmem:[%s1517_s1 + $0xb8] sm:$0xff]   ;;  %v1181_v54 = vld [vmem:[%s1517_s1 + $0x180] sm:$0xff]  }
   0xf   :  { %1059 = vmatpush3.bf16.msra.mxu1 %v1151_v12  ;;  %1038 = vmatprep.subr.bf16.mxu0 %v1152_v13  ;;  %v1172_v34 = vld [vmem:[%s1516_s0] ss:$16 sps:$4 sm:$0xff]   ;;  %v1176_v39 = vld [vmem:[%s1516_s0 + $0x4] ss:$16 sps:$4 sm:$0xff]   ;;  %v1182_v59 = vld [vmem:[%s1517_s1 + $0x148] sm:$0xff]  }
  0x10   :  { %1060 = vmatprep.subr.bf16.mxu1 %v1153_v14  ;;  %v1174_v35 = vld [vmem:[%s1516_s0 + $0x20] ss:$16 sps:$4 sm:$0xff]   ;;  %v1177_v40 = vld [vmem:[%s1516_s0 + $0x24] ss:$16 sps:$4 sm:$0xff]   ;;  %v55_v45 = vrot.slane %v1172_v34, %v1380_v44  ;;  %v62_v47 = vrot.slane %v1176_v39, %v1380_v44  ;;  %v1183_v60 = vld [vmem:[%s1517_s1 + $0x1c8] sm:$0xff]  }
  0x11   :  { %v69_v46 = vrot.slane %v1174_v35, %v1380_v44  ;;  %v76_v48 = vrot.slane %v1177_v40, %v1380_v44  ;;  %v1184_v61 = vld [vmem:[%s1517_s1 + $0x108] sm:$0xff]   ;;  %v1186_v63 = vld [vmem:[%s1517_s1 + $0x150] sm:$0xff]   ;;  %v1190_v3 = vld [vmem:[%s1517_s1 + $0x158] sm:$0xff]   ;;  %v1221_v40 = vmov 0.0  }
  0x12   :  { %1039 = vmatpush3.bf16.msra.mxu0 %v1154_v15  ;;  %v1185_v62 = vld [vmem:[%s1517_s1 + $0x188] sm:$0xff]   ;;  %v1187_v0 = vld [vmem:[%s1517_s1 + $0x1d0] sm:$0xff]   ;;  %v1191_v4 = vld [vmem:[%s1517_s1 + $0x1d8] sm:$0xff]  }
  0x13   :  { %1061 = vmatpush3.bf16.msra.mxu1 %v1155_v16  ;;  %1040 = vmatprep.subr.bf16.mxu0 %v1156_v17  ;;  %v78_v49 = vcombine.high %v55_v45, %v69_v46  ;;  %v80_v50 = vcombine.high %v62_v47, %v76_v48  ;;  %v77_v51 = vcombine.low %v55_v45, %v69_v46  ;;  %v1188_v1 = vld [vmem:[%s1517_s1 + $0x110] sm:$0xff]   ;;  %v1192_v5 = vld [vmem:[%s1517_s1 + $0x118] sm:$0xff]   ;;  %v1194_v7 = vld [vmem:[%s1517_s1 + $0x160] sm:$0xff]  }
  0x14   :  { %1062 = vmatprep.subr.bf16.mxu1 %v1157_v18  ;;  %v79_v52 = vcombine.low %v62_v47, %v76_v48  ;;  %v1189_v2 = vld [vmem:[%s1517_s1 + $0x190] sm:$0xff]   ;;  %v1193_v6 = vld [vmem:[%s1517_s1 + $0x198] sm:$0xff]   ;;  %v1195_v8 = vld [vmem:[%s1517_s1 + $0x1e0] sm:$0xff]  }
  0x15   :  { %v126_v55 = vpack.c.bf16 %v78_v49, %v78_v49  ;;  %v128_v56 = vpack.c.bf16 %v80_v50, %v80_v50  ;;  %v125_v57 = vpack.c.bf16 %v77_v51, %v77_v51  ;;  %v1196_v9 = vld [vmem:[%s1517_s1 + $0x120] sm:$0xff]   ;;  %v1198_v11 = vld [vmem:[%s1517_s1 + $0x168] sm:$0xff]   ;;  %v1202_v15 = vld [vmem:[%s1517_s1 + $0x170] sm:$0xff]  }
  0x16   :  { %1041 = vmatpush3.bf16.msra.mxu0 %v1158_v19  ;;  %v127_v58 = vpack.c.bf16 %v79_v52, %v79_v52  ;;  %v1197_v10 = vld [vmem:[%s1517_s1 + $0x1a0] sm:$0xff]   ;;  %v1199_v12 = vld [vmem:[%s1517_s1 + $0x1e8] sm:$0xff]   ;;  %v1203_v16 = vld [vmem:[%s1517_s1 + $0x1f0] sm:$0xff]  }
  0x17   :  { %1063 = vmatpush3.bf16.msra.mxu1 %v1159_v20  ;;  %1042 = vmatprep.subr.bf16.mxu0 %v1160_v21  ;;  %v1200_v13 = vld [vmem:[%s1517_s1 + $0x128] sm:$0xff]   ;;  %v1204_v17 = vld [vmem:[%s1517_s1 + $0x130] sm:$0xff]   ;;  %v1206_v19 = vld [vmem:[%s1517_s1 + $0x178] sm:$0xff]  }
  0x18   :  { %1064 = vmatprep.subr.bf16.mxu1 %v1161_v22  ;;  %684 = vmatprep.mubr.bf16.mxu0 %v126_v55  ;;  %v1201_v14 = vld [vmem:[%s1517_s1 + $0x1a8] sm:$0xff]   ;;  %v1205_v18 = vld [vmem:[%s1517_s1 + $0x1b0] sm:$0xff]   ;;  %v1207_v20 = vld [vmem:[%s1517_s1 + $0x1f8] sm:$0xff]  }
  0x19   :  { %724 = vmatprep.mubr.bf16.mxu1 %v128_v56  ;;  %v1210_v21 = vld [vmem:[%s1516_s0 + $0x8] ss:$16 sps:$4 sm:$0xff]   ;;  %v1216_v39 = vld [vmem:[%s1519_s3] sm:$0xff]  }
  0x1a   :  { %1043 = vmatpush3.bf16.msra.mxu0 %v1162_v23  ;;  %v1212_v22 = vld [vmem:[%s1516_s0 + $0x28] ss:$16 sps:$4 sm:$0xff]   ;;  %v1214_v23 = vld [vmem:[%s1516_s0 + $0xc] ss:$16 sps:$4 sm:$0xff]   ;;  %v959_v46 = vld [vmem:[%s1518_s2] ss:$0 sm:$0xff] }
  0x1b   :  { %1065 = vmatpush3.bf16.msra.mxu1 %v1163_v24  ;;  %1044 = vmatprep.subr.bf16.mxu0 %v1164_v25  ;;  %v1208_v24 = vld [vmem:[%s1517_s1 + $0x138] sm:$0xff]   ;;  %v1217_v41 = vld [vmem:[%s1519_s3 + $0x8] sm:$0xff]  }
  0x1c   :  { %1066 = vmatprep.subr.bf16.mxu1 %v1165_v26  ;;  %v1209_v25 = vld [vmem:[%s1517_s1 + $0x1b8] sm:$0xff]  }
  0x1d   :  { %v1215_v26 = vld [vmem:[%s1516_s0 + $0x2c] ss:$16 sps:$4 sm:$0xff]  }
  0x1e   :  { %1045 = vmatpush3.bf16.msra.mxu0 %v1166_v27  ;;  %v91_v27 = vrot.slane %v1210_v21, %v1380_v44 }
  0x1f   :  { %1067 = vmatpush3.bf16.msra.mxu1 %v1167_v28  ;;  %1046 = vmatprep.subr.bf16.mxu0 %v1168_v29  ;;  %v105_v28 = vrot.slane %v1212_v22, %v1380_v44  ;;  %v98_v29 = vrot.slane %v1214_v23, %v1380_v44 }
  0x20   :  { %1068 = vmatprep.subr.bf16.mxu1 %v1169_v30  ;;  %v112_v30 = vrot.slane %v1215_v26, %v1380_v44 }
  0x21   :  { %v114_v31 = vcombine.high %v91_v27, %v105_v28 }
  0x22   :  { %1047 = vmatpush3.bf16.msra.mxu0 %v1170_v32  ;;  %v113_v32 = vcombine.low %v91_v27, %v105_v28  ;;  %v115_v34 = vcombine.low %v98_v29, %v112_v30 }
  0x23   :  { %1069 = vmatpush3.bf16.msra.mxu1 %v1171_v33  ;;  %1076 = vmatprep.subr.bf16.mxu0 %v1178_v42  ;;  %v116_v33 = vcombine.high %v98_v29, %v112_v30  ;;  %v130_v35 = vpack.c.bf16 %v114_v31, %v114_v31  ;;  %v1218_v42 = vld [vmem:[%s1519_s3 + $0x10] sm:$0xff]  }
  0x24   :  { %1098 = vmatprep.subr.bf16.mxu1 %v1179_v43  ;;  %v129_v36 = vpack.c.bf16 %v113_v32, %v113_v32  ;;  %v131_v38 = vpack.c.bf16 %v115_v34, %v115_v34  ;;  %v1219_v43 = vld [vmem:[%s1519_s3 + $0x18] sm:$0xff]  }
  0x25   :  { %685 = vmatmul.mubr.bf16.vlgmr.msra.gmra.mrb[0].mxu0 %v125_v57  ;;  %v132_v37 = vpack.c.bf16 %v116_v33, %v116_v33 }
  0x26   :  { %725 = vmatmul.mubr.bf16.vlgmr.msra.gmra.mrb[0].mxu1 %v127_v58  ;;  %1077 = vmatpush3.bf16.msra.mxu0 %v1180_v53 }
  0x27   :  { %1099 = vmatpush3.bf16.msra.mxu1 %v1181_v54  ;;  %1078 = vmatprep.subr.bf16.mxu0 %v1182_v59 }
  0x28   :  { %1100 = vmatprep.subr.bf16.mxu1 %v1183_v60  ;;  %764 = vmatprep.mubr.bf16.mxu0 %v130_v35 }
  0x29   :  { %804 = vmatprep.mubr.bf16.mxu1 %v132_v37 }
  0x2a   :  { %1079 = vmatpush3.bf16.msra.mxu0 %v1184_v61 }
  0x2b   :  { %1101 = vmatpush3.bf16.msra.mxu1 %v1185_v62  ;;  %1080 = vmatprep.subr.bf16.mxu0 %v1186_v63 }
  0x2c   :  { %1102 = vmatprep.subr.bf16.mxu1 %v1187_v0 }
  0x2e   :  { %1081 = vmatpush3.bf16.msra.mxu0 %v1188_v1 }
  0x2f   :  { %1103 = vmatpush3.bf16.msra.mxu1 %v1189_v2  ;;  %1082 = vmatprep.subr.bf16.mxu0 %v1190_v3 }
  0x30   :  { %1104 = vmatprep.subr.bf16.mxu1 %v1191_v4 }
  0x32   :  { %1083 = vmatpush3.bf16.msra.mxu0 %v1192_v5 }
  0x33   :  { %1105 = vmatpush3.bf16.msra.mxu1 %v1193_v6  ;;  %1084 = vmatprep.subr.bf16.mxu0 %v1194_v7  ;;  %v1024_v7 = vld [vmem:[%s1520_s4] ss:$0 sm:$0xff] }
  0x34   :  { %1106 = vmatprep.subr.bf16.mxu1 %v1195_v8 }
  0x36   :  { %1085 = vmatpush3.bf16.msra.mxu0 %v1196_v9 }
  0x37   :  { %1107 = vmatpush3.bf16.msra.mxu1 %v1197_v10  ;;  %1086 = vmatprep.subr.bf16.mxu0 %v1198_v11 }
  0x38   :  { %1108 = vmatprep.subr.bf16.mxu1 %v1199_v12  ;;  %v1030_v12 = vld [vmem:[%s1521_s5] ss:$0 sm:$0xff] }
  0x3a   :  { %1087 = vmatpush3.bf16.msra.mxu0 %v1200_v13 }
  0x3b   :  { %1109 = vmatpush3.bf16.msra.mxu1 %v1201_v14  ;;  %1088 = vmatprep.subr.bf16.mxu0 %v1202_v15 }
  0x3c   :  { %1110 = vmatprep.subr.bf16.mxu1 %v1203_v16 }
  0x3e   :  { %1089 = vmatpush3.bf16.msra.mxu0 %v1204_v17  ;;  %v1031_v17 = vld [vmem:[#allocation2] ss:$0 sm:$0xff] }
  0x3f   :  { %1111 = vmatpush3.bf16.msra.mxu1 %v1205_v18  ;;  %1090 = vmatprep.subr.bf16.mxu0 %v1206_v19 }
  0x40   :  { %1112 = vmatprep.subr.bf16.mxu1 %v1207_v20 }
  0x42   :  { %1091 = vmatpush3.bf16.msra.mxu0 %v1208_v24 }
  0x43   :  { %1113 = vmatpush3.bf16.msra.mxu1 %v1209_v25  ;;  %1125 = vmatprep.subr.bf16.mxu0 %v1221_v40 }
  0x45   :  { %765 = vmatmul.mubr.bf16.vlgmr.msra.gmra.mrb[4].mxu0 %v129_v36 }
  0x46   :  { %805 = vmatmul.mubr.bf16.vlgmr.msra.gmra.mrb[4].mxu1 %v131_v38  ;;  %1126 = vmatpush3.bf16.msra.mxu0 %v1216_v39 }
  0x47   :  { %1127 = vmatprep.subr.bf16.mxu0 %v1221_v40  ;;  %1133 = vmatprep.mubr.msk.bf16.mxu0 %vm1222_vm0, %v1221_v40 }
  0x4a   :  { %1128 = vmatpush3.bf16.msra.mxu0 %v1217_v41 }
  0x4b   :  { %1129 = vmatprep.subr.bf16.mxu0 %v1221_v40 }
  0x4e   :  { %1130 = vmatpush3.bf16.msra.mxu0 %v1218_v42 }
  0x4f   :  { %1131 = vmatprep.subr.bf16.mxu0 %v1221_v40 }
  0x52   :  { %1132 = vmatpush3.bf16.msra.mxu0 %v1219_v43 }
  0xf8   :  { %v1048_v44 = vpop.f32.mrb[0].mxu0 }
  0xf9   :  { %v1070_v45 = vpop.f32.mrb[0].mxu1  ;;  %v1049_v47 = vpop.f32.mrb[1].mxu0 }
  0xfa   :  { %v1071_v48 = vpop.f32.mrb[1].mxu1  ;;  %v1050_v49 = vadd.f32 %v1049_v47, %v1048_v44  ;;  %v1051_v51 = vpop.f32.mrb[2].mxu0 }
  0xfb   :  { %v1072_v50 = vadd.f32 %v1071_v48, %v1070_v45  ;;  %v1073_v52 = vpop.f32.mrb[2].mxu1  ;;  %v1052_v53 = vpop.f32.mrb[3].mxu0 }
  0xfc   :  { %v1074_v54 = vpop.f32.mrb[3].mxu1  ;;  %v687_v55 = vadd.f32 %v1050_v49, %v959_v46 }
  0xfe   :  { %v727_v56 = vadd.f32 %v1072_v50, %v687_v55 }
 0x118   :  { %v1092_v57 = vpop.f32.mrb[4].mxu0 }
 0x119   :  { %v1114_v58 = vpop.f32.mrb[4].mxu1  ;;  %v1093_v59 = vpop.f32.mrb[5].mxu0 }
 0x11a   :  { %v1115_v60 = vpop.f32.mrb[5].mxu1  ;;  %v1094_v61 = vadd.f32 %v1093_v59, %v1092_v57  ;;  %v1095_v63 = vpop.f32.mrb[6].mxu0 }
 0x11b   :  { %v1116_v62 = vadd.f32 %v1115_v60, %v1114_v58  ;;  %v1117_v0 = vpop.f32.mrb[6].mxu1  ;;  %v1096_v1 = vpop.f32.mrb[7].mxu0 }
 0x11c   :  { %v1118_v2 = vpop.f32.mrb[7].mxu1  ;;  %v767_v3 = vadd.f32 %v1094_v61, %v727_v56 }
 0x11e   :  { %v807_v4 = vadd.f32 %v1116_v62, %v767_v3 }
 0x120   :  { %v812_v5 = vmax.f32 %v807_v4, 0.0 }
 0x122   :  { %v813_v6 = vpack.c.bf16 %v812_v5, %v812_v5 }
 0x124   :  { %1134 = vmatmul.mubr.msk.bf16.vlgmr.msra.gmra.mrb[8].mxu0 %vm853_vm1, %v813_v6 }
 0x1f7   :  { %v891_v8 = vpop.f32.mrb[8].mxu0 }
 0x1f8   :  { %v892_v9 = vadd.f32 %v1024_v7, %v891_v8  ;;  %v1135_v10 = vpop.f32.mrb[9].mxu0 }
 0x1f9   :  { %v894_v11 = vpop.f32.mrb[10].mxu0 }
 0x1fa   :  { %v897_v13 = vmax.f32 %v892_v9, 0.0  ;;  %v1136_v14 = vpop.f32.mrb[11].mxu0 }
 0x1fc   :  { %v905_v15 = vmul.f32 %v1030_v12, %v897_v13 }
 0x1fe   :  { %v907_v16 = vsel %vm906_vm2, %v905_v15, 0.0 }
 0x1ff   :  { %908 = vadd.xlane.f32.xlu0 %v907_v16 }
 0x28c   :  { %v909_v18 = vpop.xlane.xlu0 %908 }
 0x28d   :  { %v917_v19 = vadd.f32 %v1031_v17, %v909_v18 }
 0x28f   :  { %919 = vst.msk [vmem:[#allocation3] sm:$0xff] %vm918_vm3, %v917_v19 }
 0x296   :  { %v937_v20 = vld [vmem:[#allocation3] sm:$0x3] }
 0x297   :  { %938 = vst [vmem:[%s1523_s7] sm:$0x3] %v937_v20 }

</bundles_post_ra>
